<compile_context>
chip_gen: v7x
topology: tpu7x:2x2x1
jax: 0.10.0
libtpu: 0.0.40
codegen_flags: <defaults>
</compile_context>

<pallas_src>
import functools

import jax
import jax.numpy as jnp
from jax.experimental import pallas as pl
from jax.experimental.pallas import tpu as pltpu


def _round_up(n, m):
    return ((n + m - 1) // m) * m


def _cdiv(a, b):
    return (a + b - 1) // b


def actor_kernel(x_ref, w1_ref, b1_ref, w2_ref, b2_ref, w3_ref, b3_ref, o_ref,
                 *, out_cols):
    """One row-tile of the fused 3-layer MLP + softmax."""
    cdt = w1_ref.dtype  # MXU operand dtype (bf16 for prod, f32 for validation)

    x = x_ref[...].astype(cdt)                                             # [tm, in]

    h1 = jnp.dot(x, w1_ref[...], preferred_element_type=jnp.float32) + b1_ref[...]
    h1 = jnp.maximum(h1, 0.0).astype(cdt)                                  # ReLU  [tm, hp]

    h2 = jnp.dot(h1, w2_ref[...], preferred_element_type=jnp.float32) + b2_ref[...]
    h2 = jnp.maximum(h2, 0.0).astype(cdt)                                  # ReLU  [tm, hp]

    logits = jnp.dot(h2, w3_ref[...], preferred_element_type=jnp.float32) + b3_ref[...]
    # Drop padded action lanes before the softmax: reductions/exp run only on the
    # real columns and the store is narrow (out block last dim == action_size).
    logits = logits[:, :out_cols]                                          # [tm, out_cols]

    m = jnp.max(logits, axis=-1, keepdims=True)
    e = jnp.exp(logits - m)
    denom = jnp.sum(e, axis=-1, keepdims=True)
    r = pl.reciprocal(denom, approx=True)      # EUP slot
    r = r * (2.0 - denom * r)                  # one Newton step -> ~f32-exact 1/denom
    o_ref[...] = (e * r).astype(o_ref.dtype)


def actor_forward(x, packed_params, action_size, *, row_tile=512, out_dtype=jnp.float32):
    """x: [B, N_o, input_size] -> [B, N_o, action_size] (softmax over actions)."""
    w1, b1, w2, b2, w3, b3 = packed_params
    B, N_o, input_size = x.shape
    hidden_pad = w1.shape[1]
    action_pad = w3.shape[1]

    rows = B * N_o
    x2d = x.reshape(rows, input_size)

    # Row-tile selection: (a) minimize padding waste (tile ~= rows / n_tiles),
    # (b) guarantee >=2 grid steps when rows allow so the "parallel" axis can be
    # sharded across v7x's two TensorCores, (c) keep sublane (8) alignment.
    n_tiles = max(1, _cdiv(rows, row_tile))
    if rows >= 16:
        n_tiles = max(n_tiles, 2)
    tile = _round_up(_cdiv(rows, n_tiles), 8)
    grid_steps = _cdiv(rows, tile)
    total_rows = grid_steps * tile
    if total_rows != rows:
        x2d = jnp.pad(x2d, ((0, total_rows - rows), (0, 0)))

    out_cols = action_size  # narrow output: write only real action columns

    # Explicit VMEM budget: weights (x2 to be safe for the fallback path),
    # double-buffered x/out tiles, f32 intermediates, plus headroom.
    w_bytes = sum(int(a.size) * a.dtype.itemsize for a in (w1, b1, w2, b2, w3, b3))
    io_bytes = 2 * tile * (input_size + out_cols) * 4
    interm_bytes = tile * (2 * hidden_pad + action_pad) * 4
    vmem_limit = int(1.5 * (2 * w_bytes + io_bytes + interm_bytes)) + (8 << 20)
    vmem_limit = max(16 << 20, min(vmem_limit, 64 << 20))  # 64 MiB = v7x physical
    # TODO(synk): for hidden_size >= ~2048, add a K grid axis over w2 with an f32
    # VMEM accumulator (init/finalize via pl.when) instead of a fully-resident w2.

    kernel = functools.partial(actor_kernel, out_cols=out_cols)

    def run(weight_mode):
        def wspec(shape):
            # Weights/biases are grid-invariant (same block every step).
            if weight_mode is None:
                return pl.BlockSpec(shape, lambda i: (0, 0))
            return pl.BlockSpec(shape, lambda i: (0, 0), pipeline_mode=weight_mode)

        return pl.pallas_call(
            kernel,
            out_shape=jax.ShapeDtypeStruct((total_rows, out_cols), out_dtype),
            grid_spec=pltpu.PrefetchScalarGridSpec(
                num_scalar_prefetch=0,
                grid=(grid_steps,),
                in_specs=[
                    pl.BlockSpec((tile, input_size), lambda i: (i, 0)),   # x rows
                    wspec((input_size, hidden_pad)),                      # w1
                    wspec((1, hidden_pad)),                               # b1
                    wspec((hidden_pad, hidden_pad)),                      # w2
                    wspec((1, hidden_pad)),                               # b2
                    wspec((hidden_pad, action_pad)),                      # w3
                    wspec((1, action_pad)),                               # b3
                ],
                out_specs=pl.BlockSpec((tile, out_cols), lambda i: (i, 0)),
            ),
            compiler_params=pltpu.CompilerParams(
                dimension_semantics=("parallel",),
                vmem_limit_bytes=vmem_limit,
            ),
        )(x2d, w1, b1, w2, b2, w3, b3)

    try:
        # Single-buffer the grid-invariant weights: halves their VMEM footprint.
        out2d = run(pl.Buffered(1))
    except Exception:
        # Older Pallas/Mosaic may reject pipeline_mode on pallas_call BlockSpecs;
        # fall back to default double buffering (correct, just more VMEM).
        out2d = run(None)

    if total_rows != rows:
        out2d = out2d[:rows]
    return out2d.reshape(B, N_o, action_size)


def init_actor_params(key, input_size, action_size, hidden_size):
    """PyTorch nn.Linear default init (U[-1/sqrt(fan_in), +1/sqrt(fan_in)]).
    Logical layout: weights [in, out] (transpose of PyTorch), biases [out]."""
    keys = jax.random.split(key, 6)

    def linear(kw, kb, fan_in, fan_out):
        bound = 1.0 / jnp.sqrt(jnp.float32(fan_in))
        w = jax.random.uniform(kw, (fan_in, fan_out), jnp.float32, -bound, bound)
        b = jax.random.uniform(kb, (fan_out,), jnp.float32, -bound, bound)
        return w, b

    w1, b1 = linear(keys[0], keys[1], input_size, hidden_size)
    w2, b2 = linear(keys[2], keys[3], hidden_size, hidden_size)
    w3, b3 = linear(keys[4], keys[5], hidden_size, action_size)
    return (w1, b1, w2, b2, w3, b3)


def pack_actor_params(params, *, weight_dtype=jnp.bfloat16, hidden_lane=None, action_lane=128):
    """Zero-pad hidden/action dims to lane multiples and cast weights.

    Zero-padded hidden columns stay exactly 0 through ReLU and contribute
    nothing downstream.  Padded action columns are sliced off in-kernel before
    the softmax, so their (zero) bias value is irrelevant.  Biases stay f32.
    hidden_lane=None -> 256 when hidden>=256 (feeds the v6e/v7x 2x256^2 MXU),
    else 128 (enough for v5e's 128-wide MXU, avoids over-padding tiny nets)."""
    w1, b1, w2, b2, w3, b3 = params
    input_size, hidden = w1.shape
    action = w3.shape[1]
    if hidden_lane is None:
        hidden_lane = 256 if hidden >= 256 else 128
    hp = _round_up(hidden, hidden_lane)
    ap = _round_up(action, action_lane)

    def pad_w(w, rows, cols):
        return jnp.pad(w, ((0, rows - w.shape[0]), (0, cols - w.shape[1])))

    w1p = pad_w(w1, input_size, hp).astype(weight_dtype)
    w2p = pad_w(w2, hp, hp).astype(weight_dtype)
    w3p = pad_w(w3, hp, ap).astype(weight_dtype)

    b1p = jnp.pad(b1, (0, hp - hidden)).reshape(1, hp).astype(jnp.float32)
    b2p = jnp.pad(b2, (0, hp - hidden)).reshape(1, hp).astype(jnp.float32)
    b3p = jnp.pad(b3, (0, ap - action)).reshape(1, ap).astype(jnp.float32)

    return (w1p, b1p, w2p, b2p, w3p, b3p)


def reference_forward(x, params, compute_dtype=jnp.float32):
    """Plain-JAX reference (same math as the PyTorch module); compute_dtype lets
    us mirror the kernel's bf16 operand quantization with f32 accumulation."""
    w1, b1, w2, b2, w3, b3 = params
    B, N_o, input_size = x.shape
    cdt = compute_dtype
    hi = jax.lax.Precision.HIGHEST
    h = x.reshape(-1, input_size).astype(cdt)
    h = jnp.maximum(jnp.dot(h, w1.astype(cdt), precision=hi,
                            preferred_element_type=jnp.float32) + b1, 0.0).astype(cdt)
    h = jnp.maximum(jnp.dot(h, w2.astype(cdt), precision=hi,
                            preferred_element_type=jnp.float32) + b2, 0.0).astype(cdt)
    logits = jnp.dot(h, w3.astype(cdt), precision=hi,
                     preferred_element_type=jnp.float32) + b3
    return jax.nn.softmax(logits, axis=-1).reshape(B, N_o, -1)


if __name__ == "__main__":
    # Small shapes consistent with Actor.forward: x = [batch, N_o, input_size]
    batch_size, N_o, input_size = 2, 8, 16
    hidden_size, action_size = 32, 4

    key = jax.random.PRNGKey(0)
    k_x, k_p = jax.random.split(key)
    x = jax.random.normal(k_x, (batch_size, N_o, input_size), jnp.float32)

    params = init_actor_params(k_p, input_size, action_size, hidden_size)

    # --- f32-weight validation path: parity with the PyTorch f32 module ------
    packed_f32 = pack_actor_params(params, weight_dtype=jnp.float32)
    out_f32 = jax.block_until_ready(actor_forward(x, packed_f32, action_size))
    assert out_f32.shape == (batch_size, N_o, action_size)

    ref_f32 = reference_forward(x, params, compute_dtype=jnp.float32)
    err_f32 = float(jnp.max(jnp.abs(out_f32 - ref_f32)))
    assert jnp.allclose(out_f32, ref_f32, atol=1e-4, rtol=0), err_f32
    # Newton-refined reciprocal -> probabilities sum to 1 to ~f32 accuracy.
    assert jnp.allclose(jnp.sum(out_f32, axis=-1), 1.0, atol=1e-5)

    # --- bf16-weight production path (MXU bf16 operands, f32 accumulation) ---
    packed_bf16 = pack_actor_params(params, weight_dtype=jnp.bfloat16)
    out_bf16 = jax.block_until_ready(actor_forward(x, packed_bf16, action_size))
    assert out_bf16.shape == (batch_size, N_o, action_size)

    ref_bf16 = reference_forward(x, params, compute_dtype=jnp.bfloat16)
    err_bf16 = float(jnp.max(jnp.abs(out_bf16 - ref_bf16)))
    assert jnp.allclose(out_bf16, ref_bf16, atol=5e-3, rtol=0), err_bf16
    assert jnp.allclose(out_bf16, ref_f32, atol=5e-2, rtol=0)
    assert jnp.allclose(jnp.sum(out_bf16, axis=-1), 1.0, atol=1e-5)

    print("KERNEL_OK")
</pallas_src>

<mosaic_0001>
module attributes {stable_mosaic.version = 11 : i64} {
  func.func @actor_kernel(%arg0: i32, %arg1: memref<8x16xf32, #tpu.memory_space<vmem>>, %arg2: memref<16x128xf32, #tpu.memory_space<vmem>>, %arg3: memref<1x128xf32, #tpu.memory_space<vmem>>, %arg4: memref<128x128xf32, #tpu.memory_space<vmem>>, %arg5: memref<1x128xf32, #tpu.memory_space<vmem>>, %arg6: memref<128x128xf32, #tpu.memory_space<vmem>>, %arg7: memref<1x128xf32, #tpu.memory_space<vmem>>, %arg8: memref<8x4xf32, #tpu.memory_space<vmem>>) attributes {dimension_semantics = [#tpu.dimension_semantics<parallel>], iteration_bounds = array<i64: 2>, scalar_prefetch = 0 : i64, scratch_operands = 0 : i64, tpu.core_type = #tpu.core_type<tc>, window_params = [{transform_indices = @transform_0, window_bounds = array<i64: 8, 16>}, {pipeline_mode = #tpu.pipeline_mode<synchronous>, transform_indices = @transform_1, window_bounds = array<i64: 16, 128>}, {pipeline_mode = #tpu.pipeline_mode<synchronous>, transform_indices = @transform_2, window_bounds = array<i64: 1, 128>}, {pipeline_mode = #tpu.pipeline_mode<synchronous>, transform_indices = @transform_3, window_bounds = array<i64: 128, 128>}, {pipeline_mode = #tpu.pipeline_mode<synchronous>, transform_indices = @transform_4, window_bounds = array<i64: 1, 128>}, {pipeline_mode = #tpu.pipeline_mode<synchronous>, transform_indices = @transform_5, window_bounds = array<i64: 128, 128>}, {pipeline_mode = #tpu.pipeline_mode<synchronous>, transform_indices = @transform_6, window_bounds = array<i64: 1, 128>}, {transform_indices = @transform_7, window_bounds = array<i64: 8, 4>}]} {
    %c0 = arith.constant 0 : index
    %c0_0 = arith.constant 0 : index
    %0 = vector.load %arg1[%c0, %c0_0] : memref<8x16xf32, #tpu.memory_space<vmem>>, vector<8x16xf32>
    %c0_1 = arith.constant 0 : index
    %c0_2 = arith.constant 0 : index
    %1 = vector.load %arg2[%c0_1, %c0_2] : memref<16x128xf32, #tpu.memory_space<vmem>>, vector<16x128xf32>
    %cst = arith.constant dense<0.000000e+00> : vector<8x128xf32>
    %2 = tpu.matmul %0, %1, %cst {dimension_numbers = #tpu.dot_dimension_numbers<[1], [0], [0], [1], [0, 0, 1, 1], [], []>} : vector<8x16xf32>, vector<16x128xf32>, vector<8x128xf32> -> vector<8x128xf32>
    %c0_3 = arith.constant 0 : index
    %c0_4 = arith.constant 0 : index
    %3 = vector.load %arg3[%c0_3, %c0_4] : memref<1x128xf32, #tpu.memory_space<vmem>>, vector<1x128xf32>
    %4 = vector.broadcast %3 : vector<1x128xf32> to vector<8x128xf32>
    %5 = arith.addf %2, %4 : vector<8x128xf32>
    %cst_5 = arith.constant 0.000000e+00 : f32
    %6 = vector.broadcast %cst_5 : f32 to vector<8x128xf32>
    %7 = arith.maximumf %5, %6 : vector<8x128xf32>
    %c0_6 = arith.constant 0 : index
    %c0_7 = arith.constant 0 : index
    %8 = vector.load %arg4[%c0_6, %c0_7] : memref<128x128xf32, #tpu.memory_space<vmem>>, vector<128x128xf32>
    %cst_8 = arith.constant dense<0.000000e+00> : vector<8x128xf32>
    %9 = tpu.matmul %7, %8, %cst_8 {dimension_numbers = #tpu.dot_dimension_numbers<[1], [0], [0], [1], [0, 0, 1, 1], [], []>} : vector<8x128xf32>, vector<128x128xf32>, vector<8x128xf32> -> vector<8x128xf32>
    %c0_9 = arith.constant 0 : index
    %c0_10 = arith.constant 0 : index
    %10 = vector.load %arg5[%c0_9, %c0_10] : memref<1x128xf32, #tpu.memory_space<vmem>>, vector<1x128xf32>
    %11 = vector.broadcast %10 : vector<1x128xf32> to vector<8x128xf32>
    %12 = arith.addf %9, %11 : vector<8x128xf32>
    %cst_11 = arith.constant 0.000000e+00 : f32
    %13 = vector.broadcast %cst_11 : f32 to vector<8x128xf32>
    %14 = arith.maximumf %12, %13 : vector<8x128xf32>
    %c0_12 = arith.constant 0 : index
    %c0_13 = arith.constant 0 : index
    %15 = vector.load %arg6[%c0_12, %c0_13] : memref<128x128xf32, #tpu.memory_space<vmem>>, vector<128x128xf32>
    %cst_14 = arith.constant dense<0.000000e+00> : vector<8x128xf32>
    %16 = tpu.matmul %14, %15, %cst_14 {dimension_numbers = #tpu.dot_dimension_numbers<[1], [0], [0], [1], [0, 0, 1, 1], [], []>} : vector<8x128xf32>, vector<128x128xf32>, vector<8x128xf32> -> vector<8x128xf32>
    %c0_15 = arith.constant 0 : index
    %c0_16 = arith.constant 0 : index
    %17 = vector.load %arg7[%c0_15, %c0_16] : memref<1x128xf32, #tpu.memory_space<vmem>>, vector<1x128xf32>
    %18 = vector.broadcast %17 : vector<1x128xf32> to vector<8x128xf32>
    %19 = arith.addf %16, %18 : vector<8x128xf32>
    %20 = vector.extract_strided_slice %19 {offsets = [0, 0], sizes = [8, 4], strides = [1, 1]} : vector<8x128xf32> to vector<8x4xf32>
    %cst_17 = arith.constant dense<0xFF800000> : vector<8xf32>
    %21 = vector.multi_reduction <maximumf>, %20, %cst_17 [1] : vector<8x4xf32> to vector<8xf32>
    %22 = vector.shape_cast %21 : vector<8xf32> to vector<8x1xf32>
    %23 = vector.broadcast %22 : vector<8x1xf32> to vector<8x4xf32>
    %24 = arith.subf %20, %23 : vector<8x4xf32>
    %25 = math.exp %24 : vector<8x4xf32>
    %cst_18 = arith.constant dense<0.000000e+00> : vector<8xf32>
    %26 = vector.multi_reduction <add>, %25, %cst_18 [1] : vector<8x4xf32> to vector<8xf32>
    %27 = vector.shape_cast %26 : vector<8xf32> to vector<8x1xf32>
    %28 = tpu.reciprocal %27 {approx = true} : vector<8x1xf32> -> vector<8x1xf32>
    %29 = arith.mulf %27, %28 : vector<8x1xf32>
    %cst_19 = arith.constant 2.000000e+00 : f32
    %30 = vector.broadcast %cst_19 : f32 to vector<8x1xf32>
    %31 = arith.subf %30, %29 : vector<8x1xf32>
    %32 = arith.mulf %28, %31 : vector<8x1xf32>
    %33 = vector.broadcast %32 : vector<8x1xf32> to vector<8x4xf32>
    %34 = arith.mulf %25, %33 : vector<8x4xf32>
    %c0_20 = arith.constant 0 : index
    %c0_21 = arith.constant 0 : index
    %35 = vector.load %arg8[%c0_20, %c0_21] : memref<8x4xf32, #tpu.memory_space<vmem>>, vector<8x4xf32>
    tpu.vector_store %arg8[%c0_20, %c0_21], %34 {strides = array<i32>} : memref<8x4xf32, #tpu.memory_space<vmem>>, vector<8x4xf32>,
    return
  }
  func.func @transform_0(%arg0: i32) -> (i32, i32) {
    %c0_i32 = arith.constant 0 : i32
    %c0_i32_0 = arith.constant 0 : i32
    return %arg0, %c0_i32 : i32, i32
  }
  func.func @transform_1(%arg0: i32) -> (i32, i32) {
    %c0_i32 = arith.constant 0 : i32
    %c0_i32_0 = arith.constant 0 : i32
    %c0_i32_1 = arith.constant 0 : i32
    return %c0_i32, %c0_i32_0 : i32, i32
  }
  func.func @transform_2(%arg0: i32) -> (i32, i32) {
    %c0_i32 = arith.constant 0 : i32
    %c0_i32_0 = arith.constant 0 : i32
    %c0_i32_1 = arith.constant 0 : i32
    return %c0_i32, %c0_i32_0 : i32, i32
  }
  func.func @transform_3(%arg0: i32) -> (i32, i32) {
    %c0_i32 = arith.constant 0 : i32
    %c0_i32_0 = arith.constant 0 : i32
    %c0_i32_1 = arith.constant 0 : i32
    return %c0_i32, %c0_i32_0 : i32, i32
  }
  func.func @transform_4(%arg0: i32) -> (i32, i32) {
    %c0_i32 = arith.constant 0 : i32
    %c0_i32_0 = arith.constant 0 : i32
    %c0_i32_1 = arith.constant 0 : i32
    return %c0_i32, %c0_i32_0 : i32, i32
  }
  func.func @transform_5(%arg0: i32) -> (i32, i32) {
    %c0_i32 = arith.constant 0 : i32
    %c0_i32_0 = arith.constant 0 : i32
    %c0_i32_1 = arith.constant 0 : i32
    return %c0_i32, %c0_i32_0 : i32, i32
  }
  func.func @transform_6(%arg0: i32) -> (i32, i32) {
    %c0_i32 = arith.constant 0 : i32
    %c0_i32_0 = arith.constant 0 : i32
    %c0_i32_1 = arith.constant 0 : i32
    return %c0_i32, %c0_i32_0 : i32, i32
  }
  func.func @transform_7(%arg0: i32) -> (i32, i32) {
    %c0_i32 = arith.constant 0 : i32
    %c0_i32_0 = arith.constant 0 : i32
    return %arg0, %c0_i32 : i32, i32
  }
}

module attributes {stable_mosaic.version = 11 : i64} {
  func.func @actor_kernel(%arg0: i32, %arg1: memref<8x16xf32, #tpu.memory_space<vmem>>, %arg2: memref<16x128xf32, #tpu.memory_space<vmem>>, %arg3: memref<1x128xf32, #tpu.memory_space<vmem>>, %arg4: memref<128x128xf32, #tpu.memory_space<vmem>>, %arg5: memref<1x128xf32, #tpu.memory_space<vmem>>, %arg6: memref<128x128xf32, #tpu.memory_space<vmem>>, %arg7: memref<1x128xf32, #tpu.memory_space<vmem>>, %arg8: memref<8x4xf32, #tpu.memory_space<vmem>>) attributes {dimension_semantics = [#tpu.dimension_semantics<parallel>], iteration_bounds = array<i64: 2>, scalar_prefetch = 0 : i64, scratch_operands = 0 : i64, tpu.core_type = #tpu.core_type<tc>, window_params = [{transform_indices = @transform_0, window_bounds = array<i64: 8, 16>}, {pipeline_mode = #tpu.pipeline_mode<synchronous>, transform_indices = @transform_1, window_bounds = array<i64: 16, 128>}, {pipeline_mode = #tpu.pipeline_mode<synchronous>, transform_indices = @transform_2, window_bounds = array<i64: 1, 128>}, {pipeline_mode = #tpu.pipeline_mode<synchronous>, transform_indices = @transform_3, window_bounds = array<i64: 128, 128>}, {pipeline_mode = #tpu.pipeline_mode<synchronous>, transform_indices = @transform_4, window_bounds = array<i64: 1, 128>}, {pipeline_mode = #tpu.pipeline_mode<synchronous>, transform_indices = @transform_5, window_bounds = array<i64: 128, 128>}, {pipeline_mode = #tpu.pipeline_mode<synchronous>, transform_indices = @transform_6, window_bounds = array<i64: 1, 128>}, {transform_indices = @transform_7, window_bounds = array<i64: 8, 4>}]} {
    %c0 = arith.constant 0 : index
    %c0_0 = arith.constant 0 : index
    %0 = vector.load %arg1[%c0, %c0_0] : memref<8x16xf32, #tpu.memory_space<vmem>>, vector<8x16xf32>
    %c0_1 = arith.constant 0 : index
    %c0_2 = arith.constant 0 : index
    %1 = vector.load %arg2[%c0_1, %c0_2] : memref<16x128xf32, #tpu.memory_space<vmem>>, vector<16x128xf32>
    %cst = arith.constant dense<0.000000e+00> : vector<8x128xf32>
    %2 = tpu.matmul %0, %1, %cst {dimension_numbers = #tpu.dot_dimension_numbers<[1], [0], [0], [1], [0, 0, 1, 1], [], []>} : vector<8x16xf32>, vector<16x128xf32>, vector<8x128xf32> -> vector<8x128xf32>
    %c0_3 = arith.constant 0 : index
    %c0_4 = arith.constant 0 : index
    %3 = vector.load %arg3[%c0_3, %c0_4] : memref<1x128xf32, #tpu.memory_space<vmem>>, vector<1x128xf32>
    %4 = vector.broadcast %3 : vector<1x128xf32> to vector<8x128xf32>
    %5 = arith.addf %2, %4 : vector<8x128xf32>
    %cst_5 = arith.constant 0.000000e+00 : f32
    %6 = vector.broadcast %cst_5 : f32 to vector<8x128xf32>
    %7 = arith.maximumf %5, %6 : vector<8x128xf32>
    %c0_6 = arith.constant 0 : index
    %c0_7 = arith.constant 0 : index
    %8 = vector.load %arg4[%c0_6, %c0_7] : memref<128x128xf32, #tpu.memory_space<vmem>>, vector<128x128xf32>
    %cst_8 = arith.constant dense<0.000000e+00> : vector<8x128xf32>
    %9 = tpu.matmul %7, %8, %cst_8 {dimension_numbers = #tpu.dot_dimension_numbers<[1], [0], [0], [1], [0, 0, 1, 1], [], []>} : vector<8x128xf32>, vector<128x128xf32>, vector<8x128xf32> -> vector<8x128xf32>
    %c0_9 = arith.constant 0 : index
    %c0_10 = arith.constant 0 : index
    %10 = vector.load %arg5[%c0_9, %c0_10] : memref<1x128xf32, #tpu.memory_space<vmem>>, vector<1x128xf32>
    %11 = vector.broadcast %10 : vector<1x128xf32> to vector<8x128xf32>
    %12 = arith.addf %9, %11 : vector<8x128xf32>
    %cst_11 = arith.constant 0.000000e+00 : f32
    %13 = vector.broadcast %cst_11 : f32 to vector<8x128xf32>
    %14 = arith.maximumf %12, %13 : vector<8x128xf32>
    %c0_12 = arith.constant 0 : index
    %c0_13 = arith.constant 0 : index
    %15 = vector.load %arg6[%c0_12, %c0_13] : memref<128x128xf32, #tpu.memory_space<vmem>>, vector<128x128xf32>
    %cst_14 = arith.constant dense<0.000000e+00> : vector<8x128xf32>
    %16 = tpu.matmul %14, %15, %cst_14 {dimension_numbers = #tpu.dot_dimension_numbers<[1], [0], [0], [1], [0, 0, 1, 1], [], []>} : vector<8x128xf32>, vector<128x128xf32>, vector<8x128xf32> -> vector<8x128xf32>
    %c0_15 = arith.constant 0 : index
    %c0_16 = arith.constant 0 : index
    %17 = vector.load %arg7[%c0_15, %c0_16] : memref<1x128xf32, #tpu.memory_space<vmem>>, vector<1x128xf32>
    %18 = vector.broadcast %17 : vector<1x128xf32> to vector<8x128xf32>
    %19 = arith.addf %16, %18 : vector<8x128xf32>
    %20 = vector.extract_strided_slice %19 {offsets = [0, 0], sizes = [8, 4], strides = [1, 1]} : vector<8x128xf32> to vector<8x4xf32>
    %cst_17 = arith.constant dense<0xFF800000> : vector<8xf32>
    %21 = vector.multi_reduction <maximumf>, %20, %cst_17 [1] : vector<8x4xf32> to vector<8xf32>
    %22 = vector.shape_cast %21 : vector<8xf32> to vector<8x1xf32>
    %23 = vector.broadcast %22 : vector<8x1xf32> to vector<8x4xf32>
    %24 = arith.subf %20, %23 : vector<8x4xf32>
    %25 = math.exp %24 : vector<8x4xf32>
    %cst_18 = arith.constant dense<0.000000e+00> : vector<8xf32>
    %26 = vector.multi_reduction <add>, %25, %cst_18 [1] : vector<8x4xf32> to vector<8xf32>
    %27 = vector.shape_cast %26 : vector<8xf32> to vector<8x1xf32>
    %28 = tpu.reciprocal %27 {approx = true} : vector<8x1xf32> -> vector<8x1xf32>
    %29 = arith.mulf %27, %28 : vector<8x1xf32>
    %cst_19 = arith.constant 2.000000e+00 : f32
    %30 = vector.broadcast %cst_19 : f32 to vector<8x1xf32>
    %31 = arith.subf %30, %29 : vector<8x1xf32>
    %32 = arith.mulf %28, %31 : vector<8x1xf32>
    %33 = vector.broadcast %32 : vector<8x1xf32> to vector<8x4xf32>
    %34 = arith.mulf %25, %33 : vector<8x4xf32>
    %c0_20 = arith.constant 0 : index
    %c0_21 = arith.constant 0 : index
    %35 = vector.load %arg8[%c0_20, %c0_21] : memref<8x4xf32, #tpu.memory_space<vmem>>, vector<8x4xf32>
    tpu.vector_store %arg8[%c0_20, %c0_21], %34 {strides = array<i32>} : memref<8x4xf32, #tpu.memory_space<vmem>>, vector<8x4xf32>,
    return
  }
  func.func @transform_0(%arg0: i32) -> (i32, i32) {
    %c0_i32 = arith.constant 0 : i32
    %c0_i32_0 = arith.constant 0 : i32
    return %arg0, %c0_i32 : i32, i32
  }
  func.func @transform_1(%arg0: i32) -> (i32, i32) {
    %c0_i32 = arith.constant 0 : i32
    %c0_i32_0 = arith.constant 0 : i32
    %c0_i32_1 = arith.constant 0 : i32
    return %c0_i32, %c0_i32_0 : i32, i32
  }
  func.func @transform_2(%arg0: i32) -> (i32, i32) {
    %c0_i32 = arith.constant 0 : i32
    %c0_i32_0 = arith.constant 0 : i32
    %c0_i32_1 = arith.constant 0 : i32
    return %c0_i32, %c0_i32_0 : i32, i32
  }
  func.func @transform_3(%arg0: i32) -> (i32, i32) {
    %c0_i32 = arith.constant 0 : i32
    %c0_i32_0 = arith.constant 0 : i32
    %c0_i32_1 = arith.constant 0 : i32
    return %c0_i32, %c0_i32_0 : i32, i32
  }
  func.func @transform_4(%arg0: i32) -> (i32, i32) {
    %c0_i32 = arith.constant 0 : i32
    %c0_i32_0 = arith.constant 0 : i32
    %c0_i32_1 = arith.constant 0 : i32
    return %c0_i32, %c0_i32_0 : i32, i32
  }
  func.func @transform_5(%arg0: i32) -> (i32, i32) {
    %c0_i32 = arith.constant 0 : i32
    %c0_i32_0 = arith.constant 0 : i32
    %c0_i32_1 = arith.constant 0 : i32
    return %c0_i32, %c0_i32_0 : i32, i32
  }
  func.func @transform_6(%arg0: i32) -> (i32, i32) {
    %c0_i32 = arith.constant 0 : i32
    %c0_i32_0 = arith.constant 0 : i32
    %c0_i32_1 = arith.constant 0 : i32
    return %c0_i32, %c0_i32_0 : i32, i32
  }
  func.func @transform_7(%arg0: i32) -> (i32, i32) {
    %c0_i32 = arith.constant 0 : i32
    %c0_i32_0 = arith.constant 0 : i32
    return %arg0, %c0_i32 : i32, i32
  }
}

</mosaic_0001>

<bundles_post_ra>
// kernel: tpu_custom_call.1
= control target key start
LH: loop header
LB: loop body
LE: loop exit
PB: predicated region body
PF: predicated region fallthrough
CT: control target
= control target key end

     0   :  { %12 = vsyncpa [#allocation3], 0  ;;  %s1436_s0 = inlined_call_operand.hbm [shape: f32[16,16], index: 0, kind: input, shape index: {}]   ;;  %s1437_s1 = inlined_call_operand.hbm [shape: f32[16,128], index: 1, kind: input, shape index: {}]   ;;  %s1438_s2 = inlined_call_operand.vmem [shape: f32[1,128], index: 2, kind: input, shape index: {}]   ;;  %s1439_s3 = inlined_call_operand.hbm [shape: f32[128,128], index: 3, kind: input, shape index: {}]   ;;  %s1440_s4 = inlined_call_operand.vmem [shape: f32[1,128], index: 4, kind: input, shape index: {}]   ;;  %s1441_s5 = inlined_call_operand.hbm [shape: f32[128,128], index: 5, kind: input, shape index: {}]   ;;  %s1442_s6 = inlined_call_operand.vmem [shape: f32[1,128], index: 6, kind: input, shape index: {}]   ;;  %s1443_s7 = inlined_call_operand.vmem [shape: f32[16,4], index: 7, kind: output, shape index: {}]  }
   0x1   :  { %14 = vsyncpa [#allocation3 + $0x1], 0 }
   0x2   :  { %15 = vsyncpa [#allocation5], 0 }
   0x3   :  { %16 = vsyncpa [#allocation8], 0  ;;  %s1191_s24 = smov 0   ;;  %s1193_s25 = smov 0  }
   0x4   :  { %s1195_s26 = smov 0   ;;  %s1197_s27 = smov 0  }
   0x5 LB: > { %s1210_s28 = sadd.s32 4294967295, %s1140_s27   ;;  %p42_p0 = scmp.ne.s32.totalorder %s1132_s25, %s1128_s24  ;;  %s1140_s27 = sphi %s1197_s27, %s1461_s27   ;;  %s1136_s26 = sphi %s1195_s26, %s1460_s26   ;;  %s1132_s25 = sphi %s1193_s25, %s1459_s25   ;;  %s1128_s24 = sphi %s1191_s24, %s1458_s24  }
   0x6   : > { %p1444_p1 = scmp.eq.s32.totalorder %s1210_s28, 0  ;;  %p721_p2 = scmp.ge.s32.totalorder %s1140_s27, 1 }
   0x7   : > { %p205_p3 = scmp.lt.s32.totalorder %s1140_s27, 3  ;;  %s1142_s8 = smov [#allocation4]  }
   0x8   : > { %p1218_p4 = por %p1444_p1, %p42_p0  ;;  %s217_s9 = sshll.u32 %s1142_s8, 4  ;;  %s1226_s9 = int_to_ptr.vmem [resolvable:$true] %s217_s9 }
   0x9   : > { %p1222_p5 = pnand %p721_p2, %p205_p3  ;;  %s1143_s11 = smov [#allocation6]  }
   0xa   : > { %s1447_s29 = scalar_select %p1218_p4, 1, 0 }
   0xb   : > { %s1448_s30 = scalar_select %p1222_p5, 1, 0 }
   0xc   : > { %p919_p6 = pneg %p1222_p5  ;;  %s233_s12 = sshll.u32 %s1143_s11, 4  ;;  %s1236_s12 = int_to_ptr.vmem [resolvable:$true] %s233_s12 }
   0xd   : > { %s1144_s13 = smov [#allocation7]   ;;  %s984_s17 = scalar_lea.hbm %s1437_s1, 256 }
   0xe   : > { %p1232_p7 = pnand %p919_p6, %p1444_p1  ;;  %s1238_s14 = sshll.u32 %s1144_s13, 4  ;;  %s250_s14 = int_to_ptr.vmem [resolvable:$true] %s1238_s14 }
   0xf   : > { %p985_p8 = scmp.ne.s32.totalorder %s1437_s1, %s984_s17  ;;  %p991_p12 = scmp.lt.u32.totalorder %s984_s17, %s1437_s1 }
  0x10   : > { %p1248_p9 = pneg %p1232_p7 }
  0x12   : > { %p987_p10 = pnand %p1248_p9, %p985_p8 }
  0x14   : > { %p988_p11 = pneg %p987_p10 }
  0x16   : > { %p993_p13 = pnand %p991_p12, %p988_p11 }
  0x18   : > { %996 = shalt.err (!%p993_p13)
}
  0x19   : > { %s997_s23 = scalar_lea.vmem %s1226_s9, 256  ;;  %p1005_p6 = scmp.lt.s32.totalorder %s1226_s9, %s1226_s9 }
  0x1a   : > { %p998_p0 = scmp.ne.s32.totalorder %s1226_s9, %s997_s23  ;;  %p1006_p1 = scmp.lt.s32.totalorder %s997_s23, %s997_s23 }
  0x1c   : > { %p1000_p2 = pnand %p998_p0, %p1248_p9  ;;  %p1007_p8 = por %p1006_p1, %p1005_p6 }
  0x1e   : > { %p1001_p3 = pneg %p1000_p2 }
  0x20   : > { %p1008_p10 = pnand %p1007_p8, %p1001_p3 }
  0x22   : > { %1011 = shalt.err (!%p1008_p10)
}
  0x23   : > { %s1145_s24 = smov 128   ;;  %s1146_s8 = smov 8  }
  0x24   : > { %922 = dma.hbm_to_vmem [thread:$0]  (!%p1232_p7), %s1437_s1, 256, %s1226_s9, [#allocation5], %s1145_s24, %s1145_s24, %s1146_s8  }
  0x25   : > { %s1012_s17 = scalar_lea.hbm %s1439_s3, 2048 }
  0x26   : > { %p1013_p1 = scmp.ne.s32.totalorder %s1439_s3, %s1012_s17  ;;  %p1019_p13 = scmp.lt.u32.totalorder %s1012_s17, %s1439_s3 }
  0x28   : > { %p1015_p11 = pnand %p1013_p1, %p1248_p9 }
  0x2a   : > { %p1016_p12 = pneg %p1015_p11 }
  0x2c   : > { %p1021_p0 = pnand %p1019_p13, %p1016_p12 }
  0x2e   : > { %1024 = shalt.err (!%p1021_p0)
}
  0x2f   : > { %s1025_s9 = scalar_lea.vmem %s1236_s12, 2048  ;;  %p1033_p8 = scmp.lt.s32.totalorder %s1236_s12, %s1236_s12 }
  0x30   : > { %p1026_p2 = scmp.ne.s32.totalorder %s1236_s12, %s1025_s9  ;;  %p1034_p10 = scmp.lt.s32.totalorder %s1025_s9, %s1025_s9 }
  0x32   : > { %p1028_p3 = pnand %p1026_p2, %p1248_p9  ;;  %p1035_p1 = por %p1034_p10, %p1033_p8 }
  0x34   : > { %p1029_p6 = pneg %p1028_p3 }
  0x36   : > { %p1036_p11 = pnand %p1035_p1, %p1029_p6 }
  0x38   : > { %1039 = shalt.err (!%p1036_p11)
}
  0x39   : > { %925 = dma.hbm_to_vmem [thread:$0]  (!%p1232_p7), %s1439_s3, 2048, %s1236_s12, [#allocation5], %s1145_s24, %s1145_s24, %s1146_s8  }
  0x3a   : > { %s1040_s16 = scalar_lea.hbm %s1441_s5, 2048 }
  0x3b   : > { %p1041_p12 = scmp.ne.s32.totalorder %s1441_s5, %s1040_s16  ;;  %p1047_p2 = scmp.lt.u32.totalorder %s1040_s16, %s1441_s5 }
  0x3d   : > { %p1043_p13 = pnand %p1041_p12, %p1248_p9 }
  0x3f   : > { %p1044_p0 = pneg %p1043_p13 }
  0x41   : > { %p1049_p3 = pnand %p1047_p2, %p1044_p0 }
  0x43   : > { %1052 = shalt.err (!%p1049_p3)
}
  0x44   : > { %s1053_s22 = scalar_lea.vmem %s250_s14, 2048  ;;  %p1061_p1 = scmp.lt.s32.totalorder %s250_s14, %s250_s14 }
  0x45   : > { %p1054_p6 = scmp.ne.s32.totalorder %s250_s14, %s1053_s22  ;;  %p1062_p11 = scmp.lt.s32.totalorder %s1053_s22, %s1053_s22 }
  0x47   : > { %p1056_p8 = pnand %p1054_p6, %p1248_p9  ;;  %p1063_p4 = por %p1062_p11, %p1061_p1 }
  0x49   : > { %p1057_p10 = pneg %p1056_p8 }
  0x4b   : > { %p1064_p5 = pnand %p1063_p4, %p1057_p10 }
  0x4d   : > { %1067 = shalt.err (!%p1064_p5)
}
  0x4e   : > { %928 = dma.hbm_to_vmem [thread:$0]  (!%p1232_p7), %s1441_s5, 2048, %s250_s14, [#allocation8], %s1145_s24, %s1145_s24, %s1146_s8  }
  0x4f   : > { %s1321_s20 = sadd.s32 1, %s1140_s27   ;;  %s29_s23 = sadd.s32 1, %s1136_s26 }
  0x50   : > { %s26_s10 = ssub.s32 %s1140_s27, %s1321_s20  ;;  %p36_p5 = scmp.ne.s32.totalorder %s1136_s26, %s1132_s25 }
  0x51   : > { %p27_p4 = scmp.eq.s32.totalorder %s26_s10, 0  ;;  %p37_p9 = scmp.eq.s32.totalorder %s1140_s27, 0 }
  0x52   : > { %p936_p12 = scmp.lt.s32.totalorder %s1140_s27, 2  ;;  %s266_s13 = sand.u32 1, %s1136_s26  }
  0x53   : > { %s1331_s11 = scalar_select %p27_p4, %s1136_s26, %s29_s23  }
  0x54   : > { %p38_p13 = por %p37_p9, %p36_p5  ;;  %s726_s15 = sshll.u32 %s266_s13, 3 }
  0x55   : > { %s727_s16 = sshll.u32 %s1140_s27, 7  ;;  %s270_s14 = scalar_lea.vmem [#allocation2], %s726_s15 }
  0x56   : > { %s1338_s19 = scalar_lea.hbm %s1436_s0, %s727_s16  ;;  %s277_s24 = sshll.u32 %s270_s14, 4  ;;  %s1340_s24 = int_to_ptr.vmem [resolvable:$true] %s277_s24 }
  0x57   : > { %p1342_p7 = pnand %p936_p12, %p38_p13  ;;  %s267_s27 = scalar_lea.sflag [#allocation3], %s266_s13 }
  0x58   : > { %s1068_s21 = scalar_lea.hbm %s1338_s19, 128  ;;  %s1073_s9 = scalar_lea.hbm %s1436_s0, 256 }
  0x59   : > { %p1069_p0 = scmp.ne.s32.totalorder %s1338_s19, %s1068_s21  ;;  %p1070_p2 = pneg %p1342_p7 }
  0x5a   : > { %p1074_p8 = scmp.lt.u32.totalorder %s1338_s19, %s1436_s0  ;;  %p1075_p10 = scmp.lt.u32.totalorder %s1073_s9, %s1068_s21 }
  0x5b   : > { %p1071_p3 = pnand %p1070_p2, %p1069_p0  ;;  %p1077_p11 = scmp.lt.u32.totalorder %s1068_s21, %s1338_s19 }
  0x5c   : > { %p1076_p1 = por %p1075_p10, %p1074_p8 }
  0x5d   : > { %p1072_p6 = pneg %p1071_p3 }
  0x5e   : > { %p1078_p4 = por %p1077_p11, %p1076_p1 }
  0x60   : > { %p1079_p5 = pnand %p1078_p4, %p1072_p6 }
  0x62   : > { %1082 = shalt.err (!%p1079_p5)
}
  0x63   : > { %s1083_s13 = scalar_lea.vmem %s1340_s24, 128  ;;  %s1147_s15 = smov [#allocation2]  }
  0x64   : > { %p1084_p9 = scmp.ne.s32.totalorder %s1340_s24, %s1083_s13  ;;  %s1088_s16 = sshll.u32 %s1147_s15, 4  ;;  %s1089_s16 = int_to_ptr.vmem [resolvable:$false] %s1088_s16 }
  0x65   : > { %s1090_s17 = scalar_lea.vmem %s1089_s16, 256  ;;  %p1091_p0 = scmp.lt.s32.totalorder %s1340_s24, %s1089_s16 }
  0x66   : > { %p1086_p12 = pnand %p1084_p9, %p1070_p2  ;;  %p1092_p3 = scmp.lt.s32.totalorder %s1090_s17, %s1083_s13 }
  0x68   : > { %p1087_p13 = pneg %p1086_p12  ;;  %p1093_p8 = por %p1092_p3, %p1091_p0 }
  0x6a   : > { %p1094_p10 = pnand %p1093_p8, %p1087_p13 }
  0x6c   : > { %1097 = shalt.err (!%p1094_p10)
}
  0x6d   : > { %932 = dma.hbm_to_vmem [thread:$0]  (!%p1342_p7), %s1338_s19, 128, %s1340_s24, %s267_s27  }
  0x6e   : > { %p1452_p6 = scmp.ne.s32.totalorder %s1448_s30, 0 }
  0x6f   : > { %s288_s18 = sand.u32 (!%p1452_p6), 1, %s1132_s25   ;;  %p1453_p2 = scmp.ne.s32.totalorder (!%p1452_p6), %s1447_s29, 0 }
  0x70   : > { %286 = sbr.rel (%p1452_p6) target bundleno = 1099 (0x44b), region = 48  ;;  %s729_s14 = sshll.u32 (!%p1452_p6), %s288_s18, 3 }
  0x71   : > { %s289_s21 = scalar_lea.sflag (!%p1452_p6), [#allocation3], %s288_s18  ;;  %s292_s22 = scalar_lea.vmem (!%p1452_p6), [#allocation2], %s729_s14 }
  0x77   : > { %1115 = dma.done.wait (%p1453_p2), %s289_s21, 128  }
  0x78   : > { %1117 = vsyncadd (%p1453_p2), %s289_s21, 4294967168  ;;  %p1454_p1 = scmp.eq.s32.totalorder %s1210_s28, 0 }
  0x7a   : > { %1119 = dma.done.wait (%p1454_p1), [#allocation5], 2304   ;;  %p1455_p11 = pmov %p1454_p1 }
  0x7b   : > { %p1456_p7 = pmov %p1454_p1 }
  0x7c   : > { %1121 = vsyncadd (%p1455_p11), [#allocation5], 4294964992 }
  0x7d   : > { %1123 = dma.done.wait (%p1456_p7), [#allocation8], 2048   ;;  %p1457_p4 = pmov %p1454_p1 }
  0x7e   : > { %v1148_v0 = vmov 0.0|0.0   ;;  %vm1149_vm0 = vmmov 0   ;;  %v1150_v1 = vmov 0.0   ;;  %v339_v2 = vld [vmem:[#allocation4] sm:$0xff]  ;;  %v340_v3 = vld [vmem:[#allocation4 + $0x8] sm:$0xff]  ;;  %v423_v5 = vld [vmem:[#allocation6] sm:$0xff] }
  0x7f   : > { %1125 = vsyncadd (%p1457_p4), [#allocation8], 4294965248  ;;  %854 = vmatprep.subr.bf16.mxu0 %v1148_v0  ;;  %781 = vmatprep.mubr.msk.f32.mxu0 %vm1149_vm0, %v1150_v1  ;;  %v855_v4 = vpack.c.bf16 %v340_v3, %v339_v2  ;;  %v424_v6 = vld [vmem:[#allocation6 + $0x8] sm:$0xff]  ;;  %v425_v7 = vld [vmem:[#allocation6 + $0x10] sm:$0xff]  ;;  %vm348_vm1 = vcmask 130048   ;;  %vm610_vm2 = vcmask 31744  }
  0x80   : > { %857 = vmatprep.subr.bf16.mxu1 %v1148_v0  ;;  %816 = vmatprep.mubr.msk.f32.mxu1 %vm1149_vm0, %v1150_v1  ;;  %v858_v8 = vpack.c.bf16 %v424_v6, %v423_v5  ;;  %v426_v9 = vld [vmem:[#allocation6 + $0x18] sm:$0xff]  ;;  %v338_v10 = vld [vmem:[%s292_s22] sm:$0xff]  ;;  %v429_v15 = vld [vmem:[#allocation6 + $0x30] sm:$0xff]  ;;  %p334_p5 = scmp.lt.s32.totalorder %s1210_s28, 1 }
  0x81   : > { %856 = vmatpush3.bf16.msra.mxu0 %v855_v4  ;;  %v861_v11 = vpack.c.bf16 %v426_v9, %v425_v7  ;;  %v427_v12 = vld [vmem:[#allocation6 + $0x20] sm:$0xff]  ;;  %v428_v13 = vld [vmem:[#allocation6 + $0x28] sm:$0xff]  ;;  %v430_v16 = vld [vmem:[#allocation6 + $0x38] sm:$0xff] }
  0x82   : > { %859 = vmatpush3.bf16.msra.mxu1 %v858_v8  ;;  %881 = vmatprep.subr.bf16.mxu0 %v1148_v0  ;;  %v864_v14 = vpack.c.bf16 %v428_v13, %v427_v12  ;;  %v867_v17 = vpack.c.bf16 %v430_v16, %v429_v15  ;;  %v431_v18 = vld [vmem:[#allocation6 + $0x40] sm:$0xff]  ;;  %v432_v19 = vld [vmem:[#allocation6 + $0x48] sm:$0xff]  ;;  %v433_v21 = vld [vmem:[#allocation6 + $0x50] sm:$0xff]  ;;  %s1463_s28 = smov (!%p334_p5, %s1210_s28), 1 }
  0x83   : > { %860 = vmatprep.subr.bf16.mxu1 %v1148_v0  ;;  %v870_v20 = vpack.c.bf16 %v432_v19, %v431_v18  ;;  %v434_v22 = vld [vmem:[#allocation6 + $0x58] sm:$0xff]  ;;  %v435_v24 = vld [vmem:[#allocation6 + $0x60] sm:$0xff]  ;;  %v436_v25 = vld [vmem:[#allocation6 + $0x68] sm:$0xff]  ;;  %s733_s12 = sshll.u32 %s1463_s28, 3 }
  0x84   : > { %782 = vmatmul.mubr.msk.f32.vlgmr.msra.gmra.mrb[0].mxu0 %vm348_vm1, %v338_v10  ;;  %v873_v23 = vpack.c.bf16 %v434_v22, %v433_v21  ;;  %v876_v26 = vpack.c.bf16 %v436_v25, %v435_v24  ;;  %v437_v27 = vld [vmem:[#allocation6 + $0x70] sm:$0xff]  ;;  %v438_v28 = vld [vmem:[#allocation6 + $0x78] sm:$0xff]  ;;  %v517_v30 = vld [vmem:[#allocation7] sm:$0xff]  ;;  %s337_s23 = scalar_lea.vmem %s1443_s7, %s733_s12 }
  0x85   : > { %851 = vmatprep.mubr.msk.f32.mxu0 %vm1149_vm0, %v1150_v1  ;;  %v879_v29 = vpack.c.bf16 %v438_v28, %v437_v27  ;;  %v518_v31 = vld [vmem:[#allocation7 + $0x8] sm:$0xff]  ;;  %v519_v32 = vld [vmem:[#allocation7 + $0x10] sm:$0xff]  ;;  %v520_v34 = vld [vmem:[#allocation7 + $0x18] sm:$0xff] }
  0x86   : > { %862 = vmatpush3.bf16.msra.mxu1 %v861_v11  ;;  %v882_v33 = vpack.c.bf16 %v518_v31, %v517_v30  ;;  %v885_v35 = vpack.c.bf16 %v520_v34, %v519_v32  ;;  %v521_v36 = vld [vmem:[#allocation7 + $0x20] sm:$0xff]  ;;  %v522_v37 = vld [vmem:[#allocation7 + $0x28] sm:$0xff]  ;;  %v523_v39 = vld [vmem:[#allocation7 + $0x30] sm:$0xff] }
  0x87   : > { %863 = vmatprep.subr.bf16.mxu1 %v1148_v0  ;;  %v888_v38 = vpack.c.bf16 %v522_v37, %v521_v36  ;;  %v524_v40 = vld [vmem:[#allocation7 + $0x38] sm:$0xff]  ;;  %v525_v42 = vld [vmem:[#allocation7 + $0x40] sm:$0xff]  ;;  %v526_v43 = vld [vmem:[#allocation7 + $0x48] sm:$0xff] }
  0x88   : > { %883 = vmatpush3.bf16.msra.mxu0 %v882_v33  ;;  %v891_v41 = vpack.c.bf16 %v524_v40, %v523_v39  ;;  %v894_v44 = vpack.c.bf16 %v526_v43, %v525_v42  ;;  %v527_v45 = vld [vmem:[#allocation7 + $0x50] sm:$0xff]  ;;  %v528_v46 = vld [vmem:[#allocation7 + $0x58] sm:$0xff]  ;;  %v529_v48 = vld [vmem:[#allocation7 + $0x60] sm:$0xff] }
  0x89   : > { %884 = vmatprep.subr.bf16.mxu0 %v1148_v0  ;;  %v897_v47 = vpack.c.bf16 %v528_v46, %v527_v45  ;;  %v530_v49 = vld [vmem:[#allocation7 + $0x68] sm:$0xff]  ;;  %v734_v51 = vld [vmem:[%s1438_s2] ss:$0 sm:$0xff]  ;;  %v531_v56 = vld [vmem:[#allocation7 + $0x70] sm:$0xff] }
  0x8a   : > { %865 = vmatpush3.bf16.msra.mxu1 %v864_v14  ;;  %v900_v50 = vpack.c.bf16 %v530_v49, %v529_v48  ;;  %v532_v57 = vld [vmem:[#allocation7 + $0x78] sm:$0xff]  ;;  %v736_v59 = vld [vmem:[%s1440_s4] ss:$0 sm:$0xff] }
  0x8b   : > { %866 = vmatprep.subr.bf16.mxu1 %v1148_v0  ;;  %v903_v58 = vpack.c.bf16 %v532_v57, %v531_v56 }
  0x8c   : > { %886 = vmatpush3.bf16.msra.mxu0 %v885_v35 }
  0x8d   : > { %887 = vmatprep.subr.bf16.mxu0 %v1148_v0 }
  0x8e   : > { %868 = vmatpush3.bf16.msra.mxu1 %v867_v17 }
  0x8f   : > { %869 = vmatprep.subr.bf16.mxu1 %v1148_v0 }
  0x90   : > { %889 = vmatpush3.bf16.msra.mxu0 %v888_v38 }
  0x91   : > { %890 = vmatprep.subr.bf16.mxu0 %v1148_v0 }
  0x92   : > { %871 = vmatpush3.bf16.msra.mxu1 %v870_v20 }
  0x93   : > { %872 = vmatprep.subr.bf16.mxu1 %v1148_v0 }
  0x94   : > { %892 = vmatpush3.bf16.msra.mxu0 %v891_v41 }
  0x95   : > { %893 = vmatprep.subr.bf16.mxu0 %v1148_v0 }
  0x96   : > { %874 = vmatpush3.bf16.msra.mxu1 %v873_v23 }
  0x97   : > { %875 = vmatprep.subr.bf16.mxu1 %v1148_v0 }
  0x98   : > { %895 = vmatpush3.bf16.msra.mxu0 %v894_v44 }
  0x99   : > { %896 = vmatprep.subr.bf16.mxu0 %v1148_v0 }
  0x9a   : > { %877 = vmatpush3.bf16.msra.mxu1 %v876_v26 }
  0x9b   : > { %878 = vmatprep.subr.bf16.mxu1 %v1148_v0 }
  0x9c   : > { %898 = vmatpush3.bf16.msra.mxu0 %v897_v47 }
  0x9d   : > { %899 = vmatprep.subr.bf16.mxu0 %v1148_v0 }
  0x9e   : > { %880 = vmatpush3.bf16.msra.mxu1 %v879_v29 }
  0xa0   : > { %901 = vmatpush3.bf16.msra.mxu0 %v900_v50 }
  0xa1   : > { %902 = vmatprep.subr.bf16.mxu0 %v1148_v0  ;;  %v737_v0 = vld [vmem:[%s1442_s6] ss:$0 sm:$0xff] }
  0xa4   : > { %904 = vmatpush3.bf16.msra.mxu0 %v903_v58 }
 0x157   : > { %v418_v52 = vpop.f32.mrb[0].mxu0 }
 0x158   : > { %v419_v53 = vadd.f32 %v734_v51, %v418_v52  ;;  %v783_v54 = vpop.f32.mrb[1].mxu0 }
 0x15a   : > { %v422_v55 = vmax.f32 %v419_v53, 0.0 }
 0x15c   : > { %817 = vmatmul.mubr.f32.vlgmr.msra.gmra.mrb[0].mxu1 %v422_v55 }
 0x22f   : > { %v512_v60 = vpop.f32.mrb[0].mxu1 }
 0x230   : > { %v513_v61 = vadd.f32 %v736_v59, %v512_v60  ;;  %v818_v62 = vpop.f32.mrb[1].mxu1 }
 0x232   : > { %v516_v63 = vmax.f32 %v513_v61, 0.0 }
 0x234   : > { %852 = vmatmul.mubr.f32.vlgmr.msra.gmra.mrb[2].mxu0 %v516_v63 }
 0x307   : > { %v606_v1 = vpop.f32.mrb[2].mxu0 }
 0x308   : > { %v607_v2 = vadd.f32 %v737_v0, %v606_v1  ;;  %v853_v3 = vpop.f32.mrb[3].mxu0 }
 0x30a   : > { %v611_v4 = vsel %vm610_vm2, %v607_v2, -inf }
 0x30b   : > { %612 = vmax.xlane.f32.xlu0 %v611_v4 }
 0x398   : > { %v613_v5 = vpop.xlane.xlu0 %612 }
 0x399   : > { %v614_v6 = vsub.f32 %v607_v2, %v613_v5 }
 0x39b   : > { %v615_v7 = vmul.f32 1.442695, %v614_v6 }
 0x39d   : > { %980 = vpow2.f32 %v615_v7 }
 0x3a7   : > { %v981_v8 = vpop.eup %980 }
 0x3a8   : > { %v617_v9 = vsel %vm610_vm2, %v981_v8, 0.0 }
 0x3a9   : > { %618 = vadd.xlane.f32.xlu0 %v617_v9 }
 0x436   : > { %v619_v10 = vpop.xlane.xlu0 %618 }
 0x437   : > { %982 = vrcp.f32 %v619_v10 }
 0x441   : > { %v983_v11 = vpop.eup %982 }
 0x442   : > { %v621_v12 = vmul.f32 %v983_v11, %v619_v10 }
 0x444   : > { %v622_v13 = vsub.f32 2.0, %v621_v12 }
 0x446   : > { %v623_v14 = vmul.f32 %v983_v11, %v622_v13 }
 0x448   : > { %v624_v15 = vmul.f32 %v981_v8, %v623_v14 }
 0x44a   : > { %625 = vst.msk [vmem:[%s337_s23] sm:$0xff] %vm610_vm2, %v624_v15 }
 0x44b PF: > { %p19_p9 = scmp.ge.s32.totalorder %s1321_s20, 4   ;;  %s1458_s24 = smov %s1132_s25 }
 0x44c   : > { %s1459_s25 = smov %s1136_s26  ;;  %s1460_s26 = smov %s1331_s11 }
 0x44d   : > { %s1461_s27 = smov %s1321_s20  ;;  %21 = sbr.rel (!%p19_p9) target bundleno = 5 (0x5), region = 100 }
 0x454   :  { %645 = vsyncpa [#allocation3], 1 }
 0x455   :  { %647 = vsyncpa [#allocation3 + $0x1], 1 }
 0x456   :  { %648 = vsyncpa [#allocation5], 1 }
 0x457   :  { %649 = vsyncpa [#allocation8], 1 }

// kernel: tpu_custom_call.1
= control target key start
LH: loop header
LB: loop body
LE: loop exit
PB: predicated region body
PF: predicated region fallthrough
CT: control target
= control target key end

     0   :  { %12 = vsyncpa [#allocation3], 0  ;;  %s1436_s0 = inlined_call_operand.hbm [shape: f32[16,16], index: 0, kind: input, shape index: {}]   ;;  %s1437_s1 = inlined_call_operand.hbm [shape: f32[16,128], index: 1, kind: input, shape index: {}]   ;;  %s1438_s2 = inlined_call_operand.vmem [shape: f32[1,128], index: 2, kind: input, shape index: {}]   ;;  %s1439_s3 = inlined_call_operand.hbm [shape: f32[128,128], index: 3, kind: input, shape index: {}]   ;;  %s1440_s4 = inlined_call_operand.vmem [shape: f32[1,128], index: 4, kind: input, shape index: {}]   ;;  %s1441_s5 = inlined_call_operand.hbm [shape: f32[128,128], index: 5, kind: input, shape index: {}]   ;;  %s1442_s6 = inlined_call_operand.vmem [shape: f32[1,128], index: 6, kind: input, shape index: {}]   ;;  %s1443_s7 = inlined_call_operand.vmem [shape: f32[16,4], index: 7, kind: output, shape index: {}]  }
   0x1   :  { %14 = vsyncpa [#allocation3 + $0x1], 0 }
   0x2   :  { %15 = vsyncpa [#allocation5], 0 }
   0x3   :  { %16 = vsyncpa [#allocation8], 0  ;;  %s1191_s24 = smov 0   ;;  %s1193_s25 = smov 0  }
   0x4   :  { %s1195_s26 = smov 0   ;;  %s1197_s27 = smov 0  }
   0x5 LB: > { %s1210_s28 = sadd.s32 4294967295, %s1140_s27   ;;  %p42_p0 = scmp.ne.s32.totalorder %s1132_s25, %s1128_s24  ;;  %s1140_s27 = sphi %s1197_s27, %s1461_s27   ;;  %s1136_s26 = sphi %s1195_s26, %s1460_s26   ;;  %s1132_s25 = sphi %s1193_s25, %s1459_s25   ;;  %s1128_s24 = sphi %s1191_s24, %s1458_s24  }
   0x6   : > { %p1444_p1 = scmp.eq.s32.totalorder %s1210_s28, 0  ;;  %p721_p2 = scmp.ge.s32.totalorder %s1140_s27, 1 }
   0x7   : > { %p205_p3 = scmp.lt.s32.totalorder %s1140_s27, 3  ;;  %s1142_s8 = smov [#allocation4]  }
   0x8   : > { %p1218_p4 = por %p1444_p1, %p42_p0  ;;  %s217_s9 = sshll.u32 %s1142_s8, 4  ;;  %s1226_s9 = int_to_ptr.vmem [resolvable:$true] %s217_s9 }
   0x9   : > { %p1222_p5 = pnand %p721_p2, %p205_p3  ;;  %s1143_s11 = smov [#allocation6]  }
   0xa   : > { %s1447_s29 = scalar_select %p1218_p4, 1, 0 }
   0xb   : > { %s1448_s30 = scalar_select %p1222_p5, 1, 0 }
   0xc   : > { %p919_p6 = pneg %p1222_p5  ;;  %s233_s12 = sshll.u32 %s1143_s11, 4  ;;  %s1236_s12 = int_to_ptr.vmem [resolvable:$true] %s233_s12 }
   0xd   : > { %s1144_s13 = smov [#allocation7]   ;;  %s984_s17 = scalar_lea.hbm %s1437_s1, 256 }
   0xe   : > { %p1232_p7 = pnand %p919_p6, %p1444_p1  ;;  %s1238_s14 = sshll.u32 %s1144_s13, 4  ;;  %s250_s14 = int_to_ptr.vmem [resolvable:$true] %s1238_s14 }
   0xf   : > { %p985_p8 = scmp.ne.s32.totalorder %s1437_s1, %s984_s17  ;;  %p991_p12 = scmp.lt.u32.totalorder %s984_s17, %s1437_s1 }
  0x10   : > { %p1248_p9 = pneg %p1232_p7 }
  0x12   : > { %p987_p10 = pnand %p1248_p9, %p985_p8 }
  0x14   : > { %p988_p11 = pneg %p987_p10 }
  0x16   : > { %p993_p13 = pnand %p991_p12, %p988_p11 }
  0x18   : > { %996 = shalt.err (!%p993_p13)
}
  0x19   : > { %s997_s23 = scalar_lea.vmem %s1226_s9, 256  ;;  %p1005_p6 = scmp.lt.s32.totalorder %s1226_s9, %s1226_s9 }
  0x1a   : > { %p998_p0 = scmp.ne.s32.totalorder %s1226_s9, %s997_s23  ;;  %p1006_p1 = scmp.lt.s32.totalorder %s997_s23, %s997_s23 }
  0x1c   : > { %p1000_p2 = pnand %p998_p0, %p1248_p9  ;;  %p1007_p8 = por %p1006_p1, %p1005_p6 }
  0x1e   : > { %p1001_p3 = pneg %p1000_p2 }
  0x20   : > { %p1008_p10 = pnand %p1007_p8, %p1001_p3 }
  0x22   : > { %1011 = shalt.err (!%p1008_p10)
}
  0x23   : > { %s1145_s24 = smov 128   ;;  %s1146_s8 = smov 8  }
  0x24   : > { %922 = dma.hbm_to_vmem [thread:$0]  (!%p1232_p7), %s1437_s1, 256, %s1226_s9, [#allocation5], %s1145_s24, %s1145_s24, %s1146_s8  }
  0x25   : > { %s1012_s17 = scalar_lea.hbm %s1439_s3, 2048 }
  0x26   : > { %p1013_p1 = scmp.ne.s32.totalorder %s1439_s3, %s1012_s17  ;;  %p1019_p13 = scmp.lt.u32.totalorder %s1012_s17, %s1439_s3 }
  0x28   : > { %p1015_p11 = pnand %p1013_p1, %p1248_p9 }
  0x2a   : > { %p1016_p12 = pneg %p1015_p11 }
  0x2c   : > { %p1021_p0 = pnand %p1019_p13, %p1016_p12 }
  0x2e   : > { %1024 = shalt.err (!%p1021_p0)
}
  0x2f   : > { %s1025_s9 = scalar_lea.vmem %s1236_s12, 2048  ;;  %p1033_p8 = scmp.lt.s32.totalorder %s1236_s12, %s1236_s12 }
  0x30   : > { %p1026_p2 = scmp.ne.s32.totalorder %s1236_s12, %s1025_s9  ;;  %p1034_p10 = scmp.lt.s32.totalorder %s1025_s9, %s1025_s9 }
  0x32   : > { %p1028_p3 = pnand %p1026_p2, %p1248_p9  ;;  %p1035_p1 = por %p1034_p10, %p1033_p8 }
  0x34   : > { %p1029_p6 = pneg %p1028_p3 }
  0x36   : > { %p1036_p11 = pnand %p1035_p1, %p1029_p6 }
  0x38   : > { %1039 = shalt.err (!%p1036_p11)
}
  0x39   : > { %925 = dma.hbm_to_vmem [thread:$0]  (!%p1232_p7), %s1439_s3, 2048, %s1236_s12, [#allocation5], %s1145_s24, %s1145_s24, %s1146_s8  }
  0x3a   : > { %s1040_s16 = scalar_lea.hbm %s1441_s5, 2048 }
  0x3b   : > { %p1041_p12 = scmp.ne.s32.totalorder %s1441_s5, %s1040_s16  ;;  %p1047_p2 = scmp.lt.u32.totalorder %s1040_s16, %s1441_s5 }
  0x3d   : > { %p1043_p13 = pnand %p1041_p12, %p1248_p9 }
  0x3f   : > { %p1044_p0 = pneg %p1043_p13 }
  0x41   : > { %p1049_p3 = pnand %p1047_p2, %p1044_p0 }
  0x43   : > { %1052 = shalt.err (!%p1049_p3)
}
  0x44   : > { %s1053_s22 = scalar_lea.vmem %s250_s14, 2048  ;;  %p1061_p1 = scmp.lt.s32.totalorder %s250_s14, %s250_s14 }
  0x45   : > { %p1054_p6 = scmp.ne.s32.totalorder %s250_s14, %s1053_s22  ;;  %p1062_p11 = scmp.lt.s32.totalorder %s1053_s22, %s1053_s22 }
  0x47   : > { %p1056_p8 = pnand %p1054_p6, %p1248_p9  ;;  %p1063_p4 = por %p1062_p11, %p1061_p1 }
  0x49   : > { %p1057_p10 = pneg %p1056_p8 }
  0x4b   : > { %p1064_p5 = pnand %p1063_p4, %p1057_p10 }
  0x4d   : > { %1067 = shalt.err (!%p1064_p5)
}
  0x4e   : > { %928 = dma.hbm_to_vmem [thread:$0]  (!%p1232_p7), %s1441_s5, 2048, %s250_s14, [#allocation8], %s1145_s24, %s1145_s24, %s1146_s8  }
  0x4f   : > { %s1321_s20 = sadd.s32 1, %s1140_s27   ;;  %s29_s23 = sadd.s32 1, %s1136_s26 }
  0x50   : > { %s26_s10 = ssub.s32 %s1140_s27, %s1321_s20  ;;  %p36_p5 = scmp.ne.s32.totalorder %s1136_s26, %s1132_s25 }
  0x51   : > { %p27_p4 = scmp.eq.s32.totalorder %s26_s10, 0  ;;  %p37_p9 = scmp.eq.s32.totalorder %s1140_s27, 0 }
  0x52   : > { %p936_p12 = scmp.lt.s32.totalorder %s1140_s27, 2  ;;  %s266_s13 = sand.u32 1, %s1136_s26  }
  0x53   : > { %s1331_s11 = scalar_select %p27_p4, %s1136_s26, %s29_s23  }
  0x54   : > { %p38_p13 = por %p37_p9, %p36_p5  ;;  %s726_s15 = sshll.u32 %s266_s13, 3 }
  0x55   : > { %s727_s16 = sshll.u32 %s1140_s27, 7  ;;  %s270_s14 = scalar_lea.vmem [#allocation2], %s726_s15 }
  0x56   : > { %s1338_s19 = scalar_lea.hbm %s1436_s0, %s727_s16  ;;  %s277_s24 = sshll.u32 %s270_s14, 4  ;;  %s1340_s24 = int_to_ptr.vmem [resolvable:$true] %s277_s24 }
  0x57   : > { %p1342_p7 = pnand %p936_p12, %p38_p13  ;;  %s267_s27 = scalar_lea.sflag [#allocation3], %s266_s13 }
  0x58   : > { %s1068_s21 = scalar_lea.hbm %s1338_s19, 128  ;;  %s1073_s9 = scalar_lea.hbm %s1436_s0, 256 }
  0x59   : > { %p1069_p0 = scmp.ne.s32.totalorder %s1338_s19, %s1068_s21  ;;  %p1070_p2 = pneg %p1342_p7 }
  0x5a   : > { %p1074_p8 = scmp.lt.u32.totalorder %s1338_s19, %s1436_s0  ;;  %p1075_p10 = scmp.lt.u32.totalorder %s1073_s9, %s1068_s21 }
  0x5b   : > { %p1071_p3 = pnand %p1070_p2, %p1069_p0  ;;  %p1077_p11 = scmp.lt.u32.totalorder %s1068_s21, %s1338_s19 }
  0x5c   : > { %p1076_p1 = por %p1075_p10, %p1074_p8 }
  0x5d   : > { %p1072_p6 = pneg %p1071_p3 }
  0x5e   : > { %p1078_p4 = por %p1077_p11, %p1076_p1 }
  0x60   : > { %p1079_p5 = pnand %p1078_p4, %p1072_p6 }
  0x62   : > { %1082 = shalt.err (!%p1079_p5)
}
  0x63   : > { %s1083_s13 = scalar_lea.vmem %s1340_s24, 128  ;;  %s1147_s15 = smov [#allocation2]  }
  0x64   : > { %p1084_p9 = scmp.ne.s32.totalorder %s1340_s24, %s1083_s13  ;;  %s1088_s16 = sshll.u32 %s1147_s15, 4  ;;  %s1089_s16 = int_to_ptr.vmem [resolvable:$false] %s1088_s16 }
  0x65   : > { %s1090_s17 = scalar_lea.vmem %s1089_s16, 256  ;;  %p1091_p0 = scmp.lt.s32.totalorder %s1340_s24, %s1089_s16 }
  0x66   : > { %p1086_p12 = pnand %p1084_p9, %p1070_p2  ;;  %p1092_p3 = scmp.lt.s32.totalorder %s1090_s17, %s1083_s13 }
  0x68   : > { %p1087_p13 = pneg %p1086_p12  ;;  %p1093_p8 = por %p1092_p3, %p1091_p0 }
  0x6a   : > { %p1094_p10 = pnand %p1093_p8, %p1087_p13 }
  0x6c   : > { %1097 = shalt.err (!%p1094_p10)
}
  0x6d   : > { %932 = dma.hbm_to_vmem [thread:$0]  (!%p1342_p7), %s1338_s19, 128, %s1340_s24, %s267_s27  }
  0x6e   : > { %p1452_p6 = scmp.ne.s32.totalorder %s1448_s30, 0 }
  0x6f   : > { %s288_s18 = sand.u32 (!%p1452_p6), 1, %s1132_s25   ;;  %p1453_p2 = scmp.ne.s32.totalorder (!%p1452_p6), %s1447_s29, 0 }
  0x70   : > { %286 = sbr.rel (%p1452_p6) target bundleno = 1099 (0x44b), region = 48  ;;  %s729_s14 = sshll.u32 (!%p1452_p6), %s288_s18, 3 }
  0x71   : > { %s289_s21 = scalar_lea.sflag (!%p1452_p6), [#allocation3], %s288_s18  ;;  %s292_s22 = scalar_lea.vmem (!%p1452_p6), [#allocation2], %s729_s14 }
  0x77   : > { %1115 = dma.done.wait (%p1453_p2), %s289_s21, 128  }
  0x78   : > { %1117 = vsyncadd (%p1453_p2), %s289_s21, 4294967168  ;;  %p1454_p1 = scmp.eq.s32.totalorder %s1210_s28, 0 }
  0x7a   : > { %1119 = dma.done.wait (%p1454_p1), [#allocation5], 2304   ;;  %p1455_p11 = pmov %p1454_p1 }
  0x7b   : > { %p1456_p7 = pmov %p1454_p1 }
  0x7c   : > { %1121 = vsyncadd (%p1455_p11), [#allocation5], 4294964992 }
  0x7d   : > { %1123 = dma.done.wait (%p1456_p7), [#allocation8], 2048   ;;  %p1457_p4 = pmov %p1454_p1 }
  0x7e   : > { %v1148_v0 = vmov 0.0|0.0   ;;  %vm1149_vm0 = vmmov 0   ;;  %v1150_v1 = vmov 0.0   ;;  %v339_v2 = vld [vmem:[#allocation4] sm:$0xff]  ;;  %v340_v3 = vld [vmem:[#allocation4 + $0x8] sm:$0xff]  ;;  %v423_v5 = vld [vmem:[#allocation6] sm:$0xff] }
  0x7f   : > { %1125 = vsyncadd (%p1457_p4), [#allocation8], 4294965248  ;;  %854 = vmatprep.subr.bf16.mxu0 %v1148_v0  ;;  %781 = vmatprep.mubr.msk.f32.mxu0 %vm1149_vm0, %v1150_v1  ;;  %v855_v4 = vpack.c.bf16 %v340_v3, %v339_v2  ;;  %v424_v6 = vld [vmem:[#allocation6 + $0x8] sm:$0xff]  ;;  %v425_v7 = vld [vmem:[#allocation6 + $0x10] sm:$0xff]  ;;  %vm348_vm1 = vcmask 130048   ;;  %vm610_vm2 = vcmask 31744  }
  0x80   : > { %857 = vmatprep.subr.bf16.mxu1 %v1148_v0  ;;  %816 = vmatprep.mubr.msk.f32.mxu1 %vm1149_vm0, %v1150_v1  ;;  %v858_v8 = vpack.c.bf16 %v424_v6, %v423_v5  ;;  %v426_v9 = vld [vmem:[#allocation6 + $0x18] sm:$0xff]  ;;  %v338_v10 = vld [vmem:[%s292_s22] sm:$0xff]  ;;  %v429_v15 = vld [vmem:[#allocation6 + $0x30] sm:$0xff]  ;;  %p334_p5 = scmp.lt.s32.totalorder %s1210_s28, 1 }
  0x81   : > { %856 = vmatpush3.bf16.msra.mxu0 %v855_v4  ;;  %v861_v11 = vpack.c.bf16 %v426_v9, %v425_v7  ;;  %v427_v12 = vld [vmem:[#allocation6 + $0x20] sm:$0xff]  ;;  %v428_v13 = vld [vmem:[#allocation6 + $0x28] sm:$0xff]  ;;  %v430_v16 = vld [vmem:[#allocation6 + $0x38] sm:$0xff] }
  0x82   : > { %859 = vmatpush3.bf16.msra.mxu1 %v858_v8  ;;  %881 = vmatprep.subr.bf16.mxu0 %v1148_v0  ;;  %v864_v14 = vpack.c.bf16 %v428_v13, %v427_v12  ;;  %v867_v17 = vpack.c.bf16 %v430_v16, %v429_v15  ;;  %v431_v18 = vld [vmem:[#allocation6 + $0x40] sm:$0xff]  ;;  %v432_v19 = vld [vmem:[#allocation6 + $0x48] sm:$0xff]  ;;  %v433_v21 = vld [vmem:[#allocation6 + $0x50] sm:$0xff]  ;;  %s1463_s28 = smov (!%p334_p5, %s1210_s28), 1 }
  0x83   : > { %860 = vmatprep.subr.bf16.mxu1 %v1148_v0  ;;  %v870_v20 = vpack.c.bf16 %v432_v19, %v431_v18  ;;  %v434_v22 = vld [vmem:[#allocation6 + $0x58] sm:$0xff]  ;;  %v435_v24 = vld [vmem:[#allocation6 + $0x60] sm:$0xff]  ;;  %v436_v25 = vld [vmem:[#allocation6 + $0x68] sm:$0xff]  ;;  %s733_s12 = sshll.u32 %s1463_s28, 3 }
  0x84   : > { %782 = vmatmul.mubr.msk.f32.vlgmr.msra.gmra.mrb[0].mxu0 %vm348_vm1, %v338_v10  ;;  %v873_v23 = vpack.c.bf16 %v434_v22, %v433_v21  ;;  %v876_v26 = vpack.c.bf16 %v436_v25, %v435_v24  ;;  %v437_v27 = vld [vmem:[#allocation6 + $0x70] sm:$0xff]  ;;  %v438_v28 = vld [vmem:[#allocation6 + $0x78] sm:$0xff]  ;;  %v517_v30 = vld [vmem:[#allocation7] sm:$0xff]  ;;  %s337_s23 = scalar_lea.vmem %s1443_s7, %s733_s12 }
  0x85   : > { %851 = vmatprep.mubr.msk.f32.mxu0 %vm1149_vm0, %v1150_v1  ;;  %v879_v29 = vpack.c.bf16 %v438_v28, %v437_v27  ;;  %v518_v31 = vld [vmem:[#allocation7 + $0x8] sm:$0xff]  ;;  %v519_v32 = vld [vmem:[#allocation7 + $0x10] sm:$0xff]  ;;  %v520_v34 = vld [vmem:[#allocation7 + $0x18] sm:$0xff] }
  0x86   : > { %862 = vmatpush3.bf16.msra.mxu1 %v861_v11  ;;  %v882_v33 = vpack.c.bf16 %v518_v31, %v517_v30  ;;  %v885_v35 = vpack.c.bf16 %v520_v34, %v519_v32  ;;  %v521_v36 = vld [vmem:[#allocation7 + $0x20] sm:$0xff]  ;;  %v522_v37 = vld [vmem:[#allocation7 + $0x28] sm:$0xff]  ;;  %v523_v39 = vld [vmem:[#allocation7 + $0x30] sm:$0xff] }
  0x87   : > { %863 = vmatprep.subr.bf16.mxu1 %v1148_v0  ;;  %v888_v38 = vpack.c.bf16 %v522_v37, %v521_v36  ;;  %v524_v40 = vld [vmem:[#allocation7 + $0x38] sm:$0xff]  ;;  %v525_v42 = vld [vmem:[#allocation7 + $0x40] sm:$0xff]  ;;  %v526_v43 = vld [vmem:[#allocation7 + $0x48] sm:$0xff] }
  0x88   : > { %883 = vmatpush3.bf16.msra.mxu0 %v882_v33  ;;  %v891_v41 = vpack.c.bf16 %v524_v40, %v523_v39  ;;  %v894_v44 = vpack.c.bf16 %v526_v43, %v525_v42  ;;  %v527_v45 = vld [vmem:[#allocation7 + $0x50] sm:$0xff]  ;;  %v528_v46 = vld [vmem:[#allocation7 + $0x58] sm:$0xff]  ;;  %v529_v48 = vld [vmem:[#allocation7 + $0x60] sm:$0xff] }
  0x89   : > { %884 = vmatprep.subr.bf16.mxu0 %v1148_v0  ;;  %v897_v47 = vpack.c.bf16 %v528_v46, %v527_v45  ;;  %v530_v49 = vld [vmem:[#allocation7 + $0x68] sm:$0xff]  ;;  %v734_v51 = vld [vmem:[%s1438_s2] ss:$0 sm:$0xff]  ;;  %v531_v56 = vld [vmem:[#allocation7 + $0x70] sm:$0xff] }
  0x8a   : > { %865 = vmatpush3.bf16.msra.mxu1 %v864_v14  ;;  %v900_v50 = vpack.c.bf16 %v530_v49, %v529_v48  ;;  %v532_v57 = vld [vmem:[#allocation7 + $0x78] sm:$0xff]  ;;  %v736_v59 = vld [vmem:[%s1440_s4] ss:$0 sm:$0xff] }
  0x8b   : > { %866 = vmatprep.subr.bf16.mxu1 %v1148_v0  ;;  %v903_v58 = vpack.c.bf16 %v532_v57, %v531_v56 }
  0x8c   : > { %886 = vmatpush3.bf16.msra.mxu0 %v885_v35 }
  0x8d   : > { %887 = vmatprep.subr.bf16.mxu0 %v1148_v0 }
  0x8e   : > { %868 = vmatpush3.bf16.msra.mxu1 %v867_v17 }
  0x8f   : > { %869 = vmatprep.subr.bf16.mxu1 %v1148_v0 }
  0x90   : > { %889 = vmatpush3.bf16.msra.mxu0 %v888_v38 }
  0x91   : > { %890 = vmatprep.subr.bf16.mxu0 %v1148_v0 }
  0x92   : > { %871 = vmatpush3.bf16.msra.mxu1 %v870_v20 }
  0x93   : > { %872 = vmatprep.subr.bf16.mxu1 %v1148_v0 }
  0x94   : > { %892 = vmatpush3.bf16.msra.mxu0 %v891_v41 }
  0x95   : > { %893 = vmatprep.subr.bf16.mxu0 %v1148_v0 }
  0x96   : > { %874 = vmatpush3.bf16.msra.mxu1 %v873_v23 }
  0x97   : > { %875 = vmatprep.subr.bf16.mxu1 %v1148_v0 }
  0x98   : > { %895 = vmatpush3.bf16.msra.mxu0 %v894_v44 }
  0x99   : > { %896 = vmatprep.subr.bf16.mxu0 %v1148_v0 }
  0x9a   : > { %877 = vmatpush3.bf16.msra.mxu1 %v876_v26 }
  0x9b   : > { %878 = vmatprep.subr.bf16.mxu1 %v1148_v0 }
  0x9c   : > { %898 = vmatpush3.bf16.msra.mxu0 %v897_v47 }
  0x9d   : > { %899 = vmatprep.subr.bf16.mxu0 %v1148_v0 }
  0x9e   : > { %880 = vmatpush3.bf16.msra.mxu1 %v879_v29 }
  0xa0   : > { %901 = vmatpush3.bf16.msra.mxu0 %v900_v50 }
  0xa1   : > { %902 = vmatprep.subr.bf16.mxu0 %v1148_v0  ;;  %v737_v0 = vld [vmem:[%s1442_s6] ss:$0 sm:$0xff] }
  0xa4   : > { %904 = vmatpush3.bf16.msra.mxu0 %v903_v58 }
 0x157   : > { %v418_v52 = vpop.f32.mrb[0].mxu0 }
 0x158   : > { %v419_v53 = vadd.f32 %v734_v51, %v418_v52  ;;  %v783_v54 = vpop.f32.mrb[1].mxu0 }
 0x15a   : > { %v422_v55 = vmax.f32 %v419_v53, 0.0 }
 0x15c   : > { %817 = vmatmul.mubr.f32.vlgmr.msra.gmra.mrb[0].mxu1 %v422_v55 }
 0x22f   : > { %v512_v60 = vpop.f32.mrb[0].mxu1 }
 0x230   : > { %v513_v61 = vadd.f32 %v736_v59, %v512_v60  ;;  %v818_v62 = vpop.f32.mrb[1].mxu1 }
 0x232   : > { %v516_v63 = vmax.f32 %v513_v61, 0.0 }
 0x234   : > { %852 = vmatmul.mubr.f32.vlgmr.msra.gmra.mrb[2].mxu0 %v516_v63 }
 0x307   : > { %v606_v1 = vpop.f32.mrb[2].mxu0 }
 0x308   : > { %v607_v2 = vadd.f32 %v737_v0, %v606_v1  ;;  %v853_v3 = vpop.f32.mrb[3].mxu0 }
 0x30a   : > { %v611_v4 = vsel %vm610_vm2, %v607_v2, -inf }
 0x30b   : > { %612 = vmax.xlane.f32.xlu0 %v611_v4 }
 0x398   : > { %v613_v5 = vpop.xlane.xlu0 %612 }
 0x399   : > { %v614_v6 = vsub.f32 %v607_v2, %v613_v5 }
 0x39b   : > { %v615_v7 = vmul.f32 1.442695, %v614_v6 }
 0x39d   : > { %980 = vpow2.f32 %v615_v7 }
 0x3a7   : > { %v981_v8 = vpop.eup %980 }
 0x3a8   : > { %v617_v9 = vsel %vm610_vm2, %v981_v8, 0.0 }
 0x3a9   : > { %618 = vadd.xlane.f32.xlu0 %v617_v9 }
 0x436   : > { %v619_v10 = vpop.xlane.xlu0 %618 }
 0x437   : > { %982 = vrcp.f32 %v619_v10 }
 0x441   : > { %v983_v11 = vpop.eup %982 }
 0x442   : > { %v621_v12 = vmul.f32 %v983_v11, %v619_v10 }
 0x444   : > { %v622_v13 = vsub.f32 2.0, %v621_v12 }
 0x446   : > { %v623_v14 = vmul.f32 %v983_v11, %v622_v13 }
 0x448   : > { %v624_v15 = vmul.f32 %v981_v8, %v623_v14 }
 0x44a   : > { %625 = vst.msk [vmem:[%s337_s23] sm:$0xff] %vm610_vm2, %v624_v15 }
 0x44b PF: > { %p19_p9 = scmp.ge.s32.totalorder %s1321_s20, 4   ;;  %s1458_s24 = smov %s1132_s25 }
 0x44c   : > { %s1459_s25 = smov %s1136_s26  ;;  %s1460_s26 = smov %s1331_s11 }
 0x44d   : > { %s1461_s27 = smov %s1321_s20  ;;  %21 = sbr.rel (!%p19_p9) target bundleno = 5 (0x5), region = 100 }
 0x454   :  { %645 = vsyncpa [#allocation3], 1 }
 0x455   :  { %647 = vsyncpa [#allocation3 + $0x1], 1 }
 0x456   :  { %648 = vsyncpa [#allocation5], 1 }
 0x457   :  { %649 = vsyncpa [#allocation8], 1 }

</bundles_post_ra>
